<compile_context>
chip_gen: v5e
topology: v5e:2x2
jax: 0.10.0
libtpu: 0.0.40
codegen_flags: <defaults>
</compile_context>

<pallas_src>
import functools

import jax
import jax.numpy as jnp
from jax.experimental import pallas as pl
from jax.experimental.pallas import tpu as pltpu


def _down_retain_kernel(x_ref, w_ref, b_ref, alpha_ref, o_ref, *, c_in):
    # x_ref block: (1, C, TP) -- already max-pooled; C on sublanes, TP pooled
    # pixels on lanes (lane-dense, full-width stores).
    pooled = x_ref[0]                               # (C, TP)

    w = w_ref[...]                                  # (Cout, Cin)
    if c_in <= 8:
        # Tiny C: a matmul would waste nearly all MXU K-lanes and the chain is
        # short enough not to bind the VALU slot.  Exact f32 broadcast FMAs.
        acc = w[:, 0:1] * pooled[0:1, :]            # (Cout, TP)
        for c in range(1, c_in):
            acc = acc + w[:, c:c + 1] * pooled[c:c + 1, :]
    else:
        # MXU matmul (lands on the otherwise idle MXU slot), f32 accumulate,
        # pinned precision so f32 inputs don't become a loose bf16 multi-pass.
        acc = jnp.dot(w, pooled,
                      preferred_element_type=jnp.float32,
                      precision=jax.lax.Precision.HIGHEST)

    acc = acc + b_ref[...]                          # bias (Cout,1) -> lane bcast
    alpha = alpha_ref[0]                            # PReLU single shared slope
    y = jnp.where(acc >= 0, acc, alpha * acc)
    o_ref[0] = y.astype(o_ref.dtype)


def _vmem_capacity_bytes():
    """Physical VMEM of the current TPU generation (conservative fallback)."""
    try:
        return int(pltpu.get_tpu_info().vmem_capacity_bytes)
    except Exception:
        return 64 * 1024 * 1024     # assume v7x-sized VMEM if the query fails


def _pick_tile_p(P, C, N, vmem_bytes, itemsize=4):
    """Lane tile for the pooled-pixel axis (ceil-div tiling, masked last block).

    TP is a multiple of 128 whenever P >= 128, sized so one (1, C, TP) f32
    block stays within a per-generation budget (bigger on v5e/v6e's 128 MiB
    VMEM, smaller on v7x's 64 MiB), and scales with C so small-channel shapes
    get wide, overhead-amortizing tiles.
    """
    per_buffer_budget = (10 * 1024 * 1024 if vmem_bytes >= 100 * 1024 * 1024
                         else 4 * 1024 * 1024)
    if P < 128:
        return P                                    # single tiny (masked) block
    max_lanes = max(128, (per_buffer_budget // (C * itemsize) // 128) * 128)
    tp = min(max_lanes, (P // 128) * 128)
    # v7x megacore: guarantee >= 2 grid steps on the parallel axes so both
    # TensorCores get work (harmless no-op on v5e/v6e).
    if N * pl.cdiv(P, tp) < 2 and tp >= 256:
        tp = max(128, ((tp // 2) // 128) * 128)
    return tp


def down_retain(x_nchw, weight, bias, alpha):
    """x_nchw: (N, C, H, W) f32; weight: (C, C, 1, 1); bias: (C,); alpha: scalar."""
    N, C, H, W = x_nchw.shape
    Ho, Wo = H // 2, W // 2                         # MaxPool2d(2) floors odd dims
    P = Ho * Wo

    # Fused 2x2 max pool in the wrapper: strided maxima (no transpose, no
    # 4-slab intermediate), then a free reshape to the lane-dense (N, C, P)
    # layout the kernel consumes.
    xc = x_nchw[:, :, : 2 * Ho, : 2 * Wo]
    hmax = jnp.maximum(xc[:, :, 0::2, :], xc[:, :, 1::2, :])        # (N,C,Ho,2Wo)
    pooled = jnp.maximum(hmax[:, :, :, 0::2], hmax[:, :, :, 1::2])  # (N,C,Ho,Wo)
    x_p = pooled.reshape(N, C, P)

    w2 = weight.reshape(C, C).astype(jnp.float32)   # (Cout, Cin)
    b2 = bias.reshape(C, 1).astype(jnp.float32)     # broadcasts along lanes
    alpha_arr = jnp.asarray([alpha], dtype=jnp.float32)

    vmem_bytes = _vmem_capacity_bytes()
    TP = _pick_tile_p(P, C, N, vmem_bytes)
    grid = (N, pl.cdiv(P, TP))
    vmem_limit = (64 * 1024 * 1024 if vmem_bytes >= 100 * 1024 * 1024
                  else 32 * 1024 * 1024)

    out = pl.pallas_call(
        functools.partial(_down_retain_kernel, c_in=C),
        out_shape=jax.ShapeDtypeStruct((N, C, P), x_nchw.dtype),
        grid_spec=pltpu.PrefetchScalarGridSpec(
            num_scalar_prefetch=0,
            grid=grid,
            in_specs=[
                pl.BlockSpec((1, C, TP), lambda n, p: (n, 0, p)),      # pooled x
                pl.BlockSpec((C, C), lambda n, p: (0, 0)),             # weight
                pl.BlockSpec((C, 1), lambda n, p: (0, 0)),             # bias
                pl.BlockSpec(memory_space=pltpu.MemorySpace.SMEM),     # alpha
            ],
            out_specs=pl.BlockSpec((1, C, TP), lambda n, p: (n, 0, p)),
        ),
        compiler_params=pltpu.CompilerParams(
            dimension_semantics=("parallel", "parallel"),
            vmem_limit_bytes=vmem_limit,
        ),
    )(x_p, w2, b2, alpha_arr)

    # (N, C, P) -> NCHW output with a free reshape (no transpose).
    return out.reshape(N, C, Ho, Wo)


def down_retain_ref(x_nchw, weight, bias, alpha):
    """Pure-JAX reference matching PyTorch semantics (for sanity check)."""
    N, C, H, W = x_nchw.shape
    Ho, Wo = H // 2, W // 2
    xc = x_nchw[:, :, : 2 * Ho, : 2 * Wo]
    pooled = xc.reshape(N, C, Ho, 2, Wo, 2).max(axis=(3, 5))
    w2 = weight.reshape(C, C)
    y = jnp.einsum("nchw,oc->nohw", pooled, w2,
                   precision=jax.lax.Precision.HIGHEST) + bias.reshape(1, C, 1, 1)
    return jnp.where(y >= 0, y, alpha * y)


if __name__ == "__main__":
    key = jax.random.PRNGKey(0)

    # --- Primary check: the module-implied small shape (VPU-FMA conv path). ---
    k_x, k_w, k_b = jax.random.split(key, 3)
    N, C, H, W = 2, 4, 16, 16
    x = jax.random.normal(k_x, (N, C, H, W), dtype=jnp.float32)
    weight = jax.random.normal(k_w, (C, C, 1, 1), dtype=jnp.float32) * 0.1
    bias = jax.random.normal(k_b, (C,), dtype=jnp.float32) * 0.1
    alpha = jnp.float32(0.25)       # nn.PReLU() default: single shared slope

    out = jax.block_until_ready(down_retain(x, weight, bias, alpha))
    ref = down_retain_ref(x, weight, bias, alpha)
    assert out.shape == (N, C, H // 2, W // 2)
    assert jnp.allclose(out, ref, atol=1e-5, rtol=1e-5)

    # --- Secondary check: MXU conv branch + ragged (non-128) multi-tile grid
    #     + odd spatial dims (MaxPool2d floor behaviour). ---
    k_x2, k_w2, k_b2 = jax.random.split(jax.random.PRNGKey(1), 3)
    N2, C2, H2, W2 = 1, 16, 31, 29
    x2 = jax.random.normal(k_x2, (N2, C2, H2, W2), dtype=jnp.float32)
    weight2 = jax.random.normal(k_w2, (C2, C2, 1, 1), dtype=jnp.float32) * 0.1
    bias2 = jax.random.normal(k_b2, (C2,), dtype=jnp.float32) * 0.1

    out2 = jax.block_until_ready(down_retain(x2, weight2, bias2, alpha))
    ref2 = down_retain_ref(x2, weight2, bias2, alpha)
    assert out2.shape == (N2, C2, H2 // 2, W2 // 2)
    assert jnp.allclose(out2, ref2, atol=1e-4, rtol=1e-4)

    print("KERNEL_OK")
</pallas_src>

<mosaic_0001>
module attributes {stable_mosaic.version = 11 : i64} {
  func.func @_down_retain_kernel(%arg0: i32, %arg1: i32, %arg2: memref<1x4x64xf32, #tpu.memory_space<vmem>>, %arg3: memref<4x4xf32, #tpu.memory_space<vmem>>, %arg4: memref<4x1xf32, #tpu.memory_space<vmem>>, %arg5: memref<1xf32, #tpu.memory_space<smem>>, %arg6: memref<1x4x64xf32, #tpu.memory_space<vmem>>) attributes {dimension_semantics = [#tpu.dimension_semantics<parallel>, #tpu.dimension_semantics<parallel>], iteration_bounds = array<i64: 2, 1>, scalar_prefetch = 0 : i64, scratch_operands = 0 : i64, tpu.core_type = #tpu.core_type<tc>, window_params = [{transform_indices = @transform_0, window_bounds = array<i64: 1, 4, 64>}, {pipeline_mode = #tpu.pipeline_mode<synchronous>, transform_indices = @transform_1, window_bounds = array<i64: 4, 4>}, {pipeline_mode = #tpu.pipeline_mode<synchronous>, transform_indices = @transform_2, window_bounds = array<i64: 4, 1>}, {transform_indices = @transform_3, window_bounds = array<i64: 1>}, {transform_indices = @transform_4, window_bounds = array<i64: 1, 4, 64>}]} {
    %c0 = arith.constant 0 : index
    %c0_0 = arith.constant 0 : index
    %c0_1 = arith.constant 0 : index
    %0 = vector.load %arg2[%c0, %c0_0, %c0_1] : memref<1x4x64xf32, #tpu.memory_space<vmem>>, vector<1x4x64xf32>
    %1 = vector.shape_cast %0 : vector<1x4x64xf32> to vector<4x64xf32>
    %c0_2 = arith.constant 0 : index
    %c0_3 = arith.constant 0 : index
    %2 = vector.load %arg3[%c0_2, %c0_3] : memref<4x4xf32, #tpu.memory_space<vmem>>, vector<4x4xf32>
    %3 = vector.extract_strided_slice %2 {offsets = [0, 0], sizes = [4, 1], strides = [1, 1]} : vector<4x4xf32> to vector<4x1xf32>
    %4 = vector.extract_strided_slice %1 {offsets = [0, 0], sizes = [1, 64], strides = [1, 1]} : vector<4x64xf32> to vector<1x64xf32>
    %5 = vector.broadcast %3 : vector<4x1xf32> to vector<4x64xf32>
    %6 = vector.broadcast %4 : vector<1x64xf32> to vector<4x64xf32>
    %7 = arith.mulf %5, %6 : vector<4x64xf32>
    %8 = vector.extract_strided_slice %2 {offsets = [0, 1], sizes = [4, 1], strides = [1, 1]} : vector<4x4xf32> to vector<4x1xf32>
    %9 = vector.extract_strided_slice %1 {offsets = [1, 0], sizes = [1, 64], strides = [1, 1]} : vector<4x64xf32> to vector<1x64xf32>
    %10 = vector.broadcast %8 : vector<4x1xf32> to vector<4x64xf32>
    %11 = vector.broadcast %9 : vector<1x64xf32> to vector<4x64xf32>
    %12 = arith.mulf %10, %11 : vector<4x64xf32>
    %13 = arith.addf %7, %12 : vector<4x64xf32>
    %14 = vector.extract_strided_slice %2 {offsets = [0, 2], sizes = [4, 1], strides = [1, 1]} : vector<4x4xf32> to vector<4x1xf32>
    %15 = vector.extract_strided_slice %1 {offsets = [2, 0], sizes = [1, 64], strides = [1, 1]} : vector<4x64xf32> to vector<1x64xf32>
    %16 = vector.broadcast %14 : vector<4x1xf32> to vector<4x64xf32>
    %17 = vector.broadcast %15 : vector<1x64xf32> to vector<4x64xf32>
    %18 = arith.mulf %16, %17 : vector<4x64xf32>
    %19 = arith.addf %13, %18 : vector<4x64xf32>
    %20 = vector.extract_strided_slice %2 {offsets = [0, 3], sizes = [4, 1], strides = [1, 1]} : vector<4x4xf32> to vector<4x1xf32>
    %21 = vector.extract_strided_slice %1 {offsets = [3, 0], sizes = [1, 64], strides = [1, 1]} : vector<4x64xf32> to vector<1x64xf32>
    %22 = vector.broadcast %20 : vector<4x1xf32> to vector<4x64xf32>
    %23 = vector.broadcast %21 : vector<1x64xf32> to vector<4x64xf32>
    %24 = arith.mulf %22, %23 : vector<4x64xf32>
    %25 = arith.addf %19, %24 : vector<4x64xf32>
    %c0_4 = arith.constant 0 : index
    %c0_5 = arith.constant 0 : index
    %26 = vector.load %arg4[%c0_4, %c0_5] : memref<4x1xf32, #tpu.memory_space<vmem>>, vector<4x1xf32>
    %27 = vector.broadcast %26 : vector<4x1xf32> to vector<4x64xf32>
    %28 = arith.addf %25, %27 : vector<4x64xf32>
    %c0_6 = arith.constant 0 : index
    %29 = memref.load %arg5[%c0_6] : memref<1xf32, #tpu.memory_space<smem>>
    %cst = arith.constant 0.000000e+00 : f32
    %30 = vector.broadcast %cst : f32 to vector<4x64xf32>
    %31 = arith.cmpf oge, %28, %30 : vector<4x64xf32>
    %32 = vector.broadcast %29 : f32 to vector<4x64xf32>
    %33 = arith.mulf %32, %28 : vector<4x64xf32>
    %34 = arith.select %31, %28, %33 : vector<4x64xi1>, vector<4x64xf32>
    %c0_7 = arith.constant 0 : index
    %c0_8 = arith.constant 0 : index
    %c0_9 = arith.constant 0 : index
    %35 = vector.load %arg6[%c0_7, %c0_8, %c0_9] : memref<1x4x64xf32, #tpu.memory_space<vmem>>, vector<1x4x64xf32>
    %36 = vector.shape_cast %35 : vector<1x4x64xf32> to vector<4x64xf32>
    %37 = vector.shape_cast %34 : vector<4x64xf32> to vector<1x4x64xf32>
    tpu.vector_store %arg6[%c0_7, %c0_8, %c0_9], %37 {strides = array<i32>} : memref<1x4x64xf32, #tpu.memory_space<vmem>>, vector<1x4x64xf32>,
    return
  }
  func.func @transform_0(%arg0: i32, %arg1: i32) -> (i32, i32, i32) {
    %c0_i32 = arith.constant 0 : i32
    %c0_i32_0 = arith.constant 0 : i32
    return %arg0, %c0_i32, %arg1 : i32, i32, i32
  }
  func.func @transform_1(%arg0: i32, %arg1: i32) -> (i32, i32) {
    %c0_i32 = arith.constant 0 : i32
    %c0_i32_0 = arith.constant 0 : i32
    %c0_i32_1 = arith.constant 0 : i32
    return %c0_i32, %c0_i32_0 : i32, i32
  }
  func.func @transform_2(%arg0: i32, %arg1: i32) -> (i32, i32) {
    %c0_i32 = arith.constant 0 : i32
    %c0_i32_0 = arith.constant 0 : i32
    %c0_i32_1 = arith.constant 0 : i32
    return %c0_i32, %c0_i32_0 : i32, i32
  }
  func.func @transform_3(%arg0: i32, %arg1: i32) -> i32 {
    %c0_i32 = arith.constant 0 : i32
    %c0_i32_0 = arith.constant 0 : i32
    return %c0_i32 : i32
  }
  func.func @transform_4(%arg0: i32, %arg1: i32) -> (i32, i32, i32) {
    %c0_i32 = arith.constant 0 : i32
    %c0_i32_0 = arith.constant 0 : i32
    return %arg0, %c0_i32, %arg1 : i32, i32, i32
  }
}

</mosaic_0001>

<bundles_post_ra>
// kernel: tpu_custom_call.1
= control target key start
LH: loop header
LB: loop body
LE: loop exit
PB: predicated region body
PF: predicated region fallthrough
CT: control target
= control target key end

     0   :  { %s735_s0 = inlined_call_operand.hbm [shape: f32[2,4,64], index: 0, kind: input, shape index: {}]   ;;  %s736_s1 = inlined_call_operand.vmem [shape: f32[4,4], index: 1, kind: input, shape index: {}]   ;;  %s737_s2 = inlined_call_operand.vmem [shape: f32[4,1], index: 2, kind: input, shape index: {}]   ;;  %s738_s3 = inlined_call_operand.<no memory space> [shape: f32[1], index: 3, kind: input, shape index: {}]   ;;  %s739_s4 = inlined_call_operand.hbm [shape: f32[2,4,64], index: 4, kind: output, shape index: {}]  }
   0x1   :  { %9 = sst [smem:[#allocation2]] %s738_s3 }
   0x2   :  { %10 = vsyncpa [#allocation4], 0 }
   0x3   :  { %12 = vsyncpa [#allocation4 + $0x1], 0 }
   0x4   :  { %13 = vsyncpa [#allocation5], 0 }
   0x5   :  { %15 = vsyncpa [#allocation5 + $0x1], 0  ;;  %s605_s17 = smov 0   ;;  %s607_s18 = smov 0  }
   0x6   :  { %s609_s19 = smov 0   ;;  %s611_s20 = smov 0  }
   0x7   :  { %s613_s21 = smov 0   ;;  %s615_s22 = smov 0  }
   0x8 LB: > { %s374_s3 = sadd.s32 4294967295, %s571_s22   ;;  %s375_s23 = sadd.s32 4294967294, %s571_s22   ;;  %s571_s22 = sphi %s615_s22, %s21_s22   ;;  %s567_s21 = sphi %s613_s21, %s748_s21   ;;  %s563_s20 = sphi %s611_s20, %s747_s20   ;;  %s559_s19 = sphi %s609_s19, %s746_s19   ;;  %s555_s18 = sphi %s607_s18, %s745_s18   ;;  %s551_s17 = sphi %s605_s17, %s744_s17  }
   0x9   : > { %s33_s24 = sadd.s32 1, %s567_s21  ;;  %s42_s25 = sadd.s32 1, %s559_s19 }
   0xa   : > { %p35_p0 = scmp.ge.s32.totalorder %s33_s24, 2  ;;  %p49_p1 = scmp.ne.s32.totalorder %s559_s19, %s555_s18 }
   0xb   : > { %p50_p2 = scmp.eq.s32.totalorder %s571_s22, 0  ;;  %p55_p3 = scmp.ne.s32.totalorder %s555_s18, %s551_s17 }
   0xc   : > { %s750_s24 = smov (%p35_p0, %s33_s24), 0  ;;  %p56_p5 = scmp.eq.s32.totalorder %s374_s3, 0 }
   0xd   : > { %p646_p4 = por %p50_p2, %p49_p1  ;;  %s37_s27 = ssub.s32 %s567_s21, %s750_s24 }
   0xe   : > { %p144_p6 = scmp.eq.s32.totalorder %s374_s3, 1  ;;  %p40_p7 = scmp.eq.s32.totalorder %s37_s27, 0 }
   0xf   : > { %p652_p8 = por %p56_p5, %p55_p3  ;;  %p150_p10 = scmp.eq.s32.totalorder %s375_s23, 1 }
  0x10   : > { %p656_p9 = por %p144_p6, %p49_p1  ;;  %p377_p12 = scmp.ge.s32.totalorder %s571_s22, 2 }
  0x11   : > { %s661_s30 = scalar_select %p40_p7, %s559_s19, %s42_s25  }
  0x12   : > { %p663_p11 = por %p150_p10, %p55_p3  ;;  %p399_p13 = scmp.lt.s32.totalorder %s571_s22, 2 }
  0x13   : > { %s179_s6 = sand.u32 1, %s559_s19   ;;  %s379_s8 = sshll.u32 %s567_s21, 2 }
  0x14   : > { %s378_s7 = sshll.u32 %s179_s6, 2  ;;  %s188_s11 = scalar_lea.hbm %s735_s0, %s379_s8 }
  0x15   : > { %s183_s12 = scalar_lea.vmem [#allocation3], %s378_s7  ;;  %s190_s14 = sshll.u32 %s188_s11, 4  ;;  %s191_s14 = int_to_ptr.hbm [resolvable:$true] %s190_s14 }
  0x16   : > { %s192_s13 = sshll.u32 %s183_s12, 4  ;;  %p392_p0 = pnand %p399_p13, %p646_p4  ;;  %s193_s13 = int_to_ptr.vmem [resolvable:$true] %s192_s13 }
  0x17   : > { %p380_p1 = scmp.ge.s32.totalorder %s571_s22, 1  ;;  %p197_p2 = scmp.lt.s32.totalorder %s571_s22, 3 }
  0x18   : > { %s180_s15 = scalar_lea.sflag [#allocation4], %s179_s6 }
  0x19   : > { %394 = dma.hbm_to_vmem [thread:$0]  (!%p392_p0), %s191_s14, 64, %s193_s13, %s180_s15  }
  0x1a   : > { %p198_p3 = pnand %p380_p1, %p197_p2 }
  0x1b   : > { %s679_s16 = sand.u32 (!%p198_p3), 1, %s555_s18  }
  0x1c   : > { %201 = sbr.rel (%p198_p3) target bundleno = 176 (0xb0), region = 36  ;;  %s381_s3 = sshll.u32 (!%p198_p3), %s679_s16, 2 }
  0x1d   : > { %s204_s23 = scalar_lea.sflag (!%p198_p3), [#allocation4], %s679_s16  ;;  %s207_s25 = scalar_lea.vmem (!%p198_p3), [#allocation3], %s381_s3 }
  0x21   : > { %542 = dma.done.wait (%p652_p8), %s204_s23, 64  }
  0x22   : > { %544 = vsyncadd (%p652_p8), %s204_s23, 4294967232  ;;  %v573_v0 = vmov 0   ;;  %v574_v1 = vmov 2   ;;  %v234_v2 = vld [vmem:[%s736_s1] sm:$0xf]  ;;  %v575_v4 = vmov 1  }
  0x23   : > { %453 = vset.pattern.permute.xlu0 %v573_v0  ;;  %455 = vset.pattern.permute.xlu1 %v574_v1  ;;  %v263_v3 = vld [vmem:[%s737_s2] sm:$0xf]  ;;  %v576_v5 = vmov 3   ;;  %s270_s28 = sld [smem:[#allocation2]]  ;;  %s384_s8 = sshll.u32 %s563_s20, 2  ;;  %vm275_vm1 = vcmask 519168  }
  0x24   : > { %457 = vset.pattern.permute.xlu2 %v573_v0  ;;  %237 = vperm.xlu0 %453, %v234_v2   ;;  %v233_v8 = vld [vmem:[%s207_s25] sm:$0xf]  ;;  %s289_s11 = scalar_lea.hbm %s739_s4, %s384_s8  ;;  %s232_s12 = scalar_lea.vmem [#allocation6], %s381_s3 }
  0x25   : > { %250 = vperm.xlu1 %455, %v234_v2   ;;  %266 = vperm.xlu2 %457, %v263_v3   ;;  %v240_v9 = vperm.slane %v233_v8, 0  ;;  %v246_v10 = vperm.slane %v233_v8, 1  ;;  %v253_v11 = vperm.slane %v233_v8, 2  ;;  %v260_v12 = vperm.slane %v233_v8, 3  ;;  %s291_s13 = sshll.u32 %s232_s12, 4  ;;  %s293_s14 = sshll.u32 %s289_s11, 4  ;;  %s292_s13 = int_to_ptr.vmem [resolvable:$true] %s291_s13  ;;  %s294_s14 = int_to_ptr.hbm [resolvable:$true] %s293_s14 }
  0x26   : > { %s278_s20 = scalar_lea.sflag [#allocation5], %s679_s16  ;;  %s503_s15 = sshra.s32 %s294_s14, 4  ;;  %s504_s15 = int_to_ptr.hbm [resolvable:$true] %s503_s15 }
  0x27   : > { %s505_s23 = scalar_lea.hbm %s504_s15, 4  ;;  %s509_s3 = scalar_lea.hbm %s739_s4, 8 }
  0x28   : > { %p506_p4 = scmp.ne.s32.totalorder %s504_s15, %s505_s23  ;;  %p510_p7 = scmp.lt.s32.totalorder %s504_s15, %s739_s4 }
  0x29   : > { %v272_v23 = vstv %s270_s28  ;;  %p511_p8 = scmp.lt.s32.totalorder %s509_s3, %s505_s23 }
  0x2a   : > { %p507_p5 = pnand %p506_p4, %p656_p9 }
  0x2b   : > { %p512_p10 = por %p511_p8, %p510_p7 }
  0x2c   : > { %454 = vset.pattern.permute.xlu0 %v575_v4  ;;  %p508_p6 = pneg %p507_p5 }
  0x2d   : > { %456 = vset.pattern.permute.xlu1 %v576_v5  ;;  %243 = vperm.xlu0 %454, %v234_v2  }
  0x2e   : > { %257 = vperm.xlu1 %456, %v234_v2   ;;  %p513_p13 = pnand %p512_p10, %p508_p6 }
  0x35   : > { %458 = vset.pattern.permute.xlu0 %v573_v0 }
  0x7f   : > { %v267_v21 = vpop.permute.xlu2 %266 }
  0x96   : > { %v238_v6 = vpop.permute.xlu0 %237 }
  0x97   : > { %v251_v7 = vpop.permute.xlu1 %250  ;;  %v241_v15 = vmul.f32 %v240_v9, %v238_v6 }
  0x98   : > { %v254_v17 = vmul.f32 %v253_v11, %v251_v7 }
  0x9f   : > { %v244_v13 = vpop.permute.xlu0 %243 }
  0xa0   : > { %v258_v14 = vpop.permute.xlu1 %257  ;;  %v247_v16 = vmul.f32 %v246_v10, %v244_v13 }
  0xa1   : > { %v261_v19 = vmul.f32 %v260_v12, %v258_v14 }
  0xa2   : > { %v248_v18 = vadd.f32 %v247_v16, %v241_v15 }
  0xa4   : > { %v255_v20 = vadd.f32 %v254_v17, %v248_v18 }
  0xa6   : > { %v262_v22 = vadd.f32 %v261_v19, %v255_v20 }
  0xa8   : > { %v269_v24 = vadd.f32 %v267_v21, %v262_v22 }
  0xaa   : > { %vm271_vm0 = vcmp.ge.f32.partialorder %v269_v24, 0.0  ;;  %v273_v25 = vmul.f32 %v272_v23, %v269_v24 }
  0xac   : > { %v274_v26 = vsel %vm271_vm0, %v269_v24, %v273_v25 }
  0xad   : > { %276 = vst.msk [vmem:[%s232_s12] sm:$0xf] %vm275_vm1, %v274_v26 }
  0xae   : > { %516 = shalt.err (!%p513_p13)
}
  0xaf   : > { %389 = dma.vmem_to_hbm [thread:$0]  (%p656_p9), %s292_s13, 64, %s294_s14, %s278_s20  }
  0xb0 PF: > { %s305_s16 = sand.u32 1, %s551_s17   ;;  %p396_p0 = pnand %p377_p12, %p663_p11 }
  0xb1   : > { %s306_s7 = scalar_lea.sflag [#allocation5], %s305_s16 }
  0xb2   : > { %p397_p1 = pneg %p396_p0 }
  0xb4   : > { %546 = dma.done.wait (%p397_p1), %s306_s7, 64  }
  0xb5   : > { %548 = vsyncadd (%p397_p1), %s306_s7, 4294967232  ;;  %s21_s22 = sadd.s32 1, %s571_s22   ;;  %s744_s17 = smov %s555_s18 }
  0xb6   : > { %p18_p2 = scmp.ge.s32.totalorder %s21_s22, 4   ;;  %s745_s18 = smov %s559_s19 }
  0xb7   : > { %s746_s19 = smov %s661_s30  ;;  %s747_s20 = smov %s567_s21 }
  0xb8   : > { %s748_s21 = smov %s750_s24  ;;  %20 = sbr.rel (!%p18_p2) target bundleno = 8 (0x8), region = 81 }
  0xbd   :  { %312 = vsyncpa [#allocation4], 1 }
  0xbe   :  { %314 = vsyncpa [#allocation4 + $0x1], 1 }
  0xbf   :  { %315 = vsyncpa [#allocation5], 1 }
  0xc0   :  { %317 = vsyncpa [#allocation5 + $0x1], 1 }

</bundles_post_ra>
